<compile_context>
chip_gen: v7x
topology: tpu7x:2x2x1
jax: 0.10.0
libtpu: 0.0.40
codegen_flags: <defaults>
</compile_context>

<pallas_src>
import math

import jax
import jax.numpy as jnp
import numpy as np
from jax.experimental import pallas as pl
from jax.experimental.pallas import tpu as pltpu

IMG = 7                                   # img_size
KS = 3                                    # conv kernel
OUT_HW = IMG - KS + 1                     # 5
N_CHANN = 1
LIN_IN = N_CHANN * OUT_HW * OUT_HW        # 25
N_OUT = 2
N_CONV_PARAMS = KS * KS * N_CHANN * N_CHANN + N_CHANN   # 10
N_LIN_PARAMS = N_OUT * LIN_IN + N_OUT                   # 52
AUG = IMG * IMG + 1                       # 50 = 49 pixels + constant-1 column

XDC_W = N_CONV_PARAMS * LIN_IN            # 250  (flat conv-Jacobian width)
XDL_W = N_LIN_PARAMS * N_OUT              # 104  (flat linear-Jacobian width)


def _round_up(n, m):
    return ((n + m - 1) // m) * m


def _build_selection():
    """Constant [50, 250] 0/1 im2col selection matrix (+ ones row for the bias dir)."""
    S = np.zeros((AUG, XDC_W), np.float32)
    for p in range(KS):
        for q in range(KS):
            k = p * KS + q
            for i in range(OUT_HW):
                for j in range(OUT_HW):
                    S[(p + i) * IMG + (q + j), k * LIN_IN + i * OUT_HW + j] = 1.0
    S[AUG - 1, KS * KS * LIN_IN:] = 1.0       # conv-bias direction: all ones
    return S


_S_NP = _build_selection()                                            # [50, 250]
_S_SEL_NP = _S_NP[:IMG * IMG, :KS * KS * LIN_IN].reshape(
    IMG * IMG, KS * KS, LIN_IN)                                       # [49, 9, 25]


def _net_kernel(x_ref, s_ref, wc_ref, wz_ref, wl_ref,
                xdc_ref, y_ref, z_ref, xdl_ref):
    """x_ref: [blk, 50] (batch on sublanes, col 49 == 1).  Resident VMEM matrices:
       s_ref [50,250], wc_ref [50,25], wz_ref [50,2], wl_ref [50,104].
       Outputs (batch-major): xdc_ref [blk,250], y_ref [blk,25], z_ref [blk,2],
       xdl_ref [blk,104]."""
    x = x_ref[...]                                                    # [blk, 50] f32
    # conv-Jacobian slabs (9 weight dirs + ones bias dir) -- one full-slab store
    xdc_ref[...] = jnp.dot(x, s_ref[...], preferred_element_type=jnp.float32)
    # primal conv (flattened) -- biases ride on the constant-1 column
    y_ref[...] = jnp.dot(x, wc_ref[...], preferred_element_type=jnp.float32)
    # primal linear
    z_ref[...] = jnp.dot(x, wz_ref[...], preferred_element_type=jnp.float32)
    # linear-Jacobian (block-diagonal yf + bias identity), already flattened
    xdl_ref[...] = jnp.dot(x, wl_ref[...], preferred_element_type=jnp.float32)


def net_automad_forward(x, conv_w, conv_b, lin_w, lin_b, *, max_block_b=2048):
    """x: [B, 1, 7, 7] NCHW. Returns (z [B,2], {'conv1','linear'} xd dict, y_conv [B,1,5,5])."""
    f32 = jnp.float32
    B = x.shape[0]

    # Pad batch only to a multiple of 128; split into >=2 blocks when there is
    # enough work so the ("parallel",) axis shards across both v7x TensorCores.
    b_min = _round_up(max(B, 1), 128)
    n_blocks = max(1, math.ceil(b_min / max_block_b))
    if b_min >= 256:
        n_blocks = max(n_blocks, 2)
    blk = _round_up(math.ceil(b_min / n_blocks), 8)
    b_pad = blk * n_blocks

    # Augmented batch-major input: 49 pixels + constant-1 column. Padded rows are
    # garbage (constant 1.0) and are sliced off below.
    x2 = x.astype(f32).reshape(B, IMG * IMG)                          # [B, 49]
    x_aug = jnp.pad(x2, ((0, b_pad - B), (0, 1)), constant_values=1.0)  # [b_pad, 50]

    # Small weight-dependent matrices (resident in VMEM, built once).
    w_flat = conv_w.astype(f32).reshape(KS * KS)
    wc_w = jnp.einsum('rkj,k->rj', jnp.asarray(_S_SEL_NP), w_flat)    # [49, 25]
    wc_mat = jnp.concatenate(
        [wc_w, jnp.broadcast_to(conv_b.astype(f32).reshape(1, 1), (1, LIN_IN))],
        axis=0)                                                       # [50, 25]

    wz = wc_mat @ lin_w.astype(f32).T                                 # [50, 2]
    wz = wz.at[AUG - 1].add(lin_b.astype(f32).reshape(N_OUT))         # fold lin bias

    eye2 = jnp.eye(N_OUT, dtype=f32)
    lw_dirs = jnp.einsum('rj,oc->rojc', wc_mat, eye2).reshape(
        AUG, N_OUT * LIN_IN * N_OUT)                                  # [50, 100]
    lb_dirs = jnp.zeros((AUG, N_OUT, N_OUT), f32).at[AUG - 1].set(eye2).reshape(
        AUG, N_OUT * N_OUT)                                           # [50, 4]
    wl_jac = jnp.concatenate([lw_dirs, lb_dirs], axis=1)              # [50, 104]

    s_mat = jnp.asarray(_S_NP)                                        # [50, 250]

    out_shapes = (
        jax.ShapeDtypeStruct((b_pad, XDC_W), f32),    # xd['conv1'] flat
        jax.ShapeDtypeStruct((b_pad, LIN_IN), f32),   # y (flattened conv out)
        jax.ShapeDtypeStruct((b_pad, N_OUT), f32),    # z
        jax.ShapeDtypeStruct((b_pad, XDL_W), f32),    # xd['linear'] flat
    )

    xdc_f, y_f, z_f, xdl_f = pl.pallas_call(
        _net_kernel,
        out_shape=out_shapes,
        grid=(n_blocks,),
        in_specs=[
            pl.BlockSpec((blk, AUG), lambda b: (b, 0)),
            pl.BlockSpec((AUG, XDC_W), lambda b: (0, 0)),
            pl.BlockSpec((AUG, LIN_IN), lambda b: (0, 0)),
            pl.BlockSpec((AUG, N_OUT), lambda b: (0, 0)),
            pl.BlockSpec((AUG, XDL_W), lambda b: (0, 0)),
        ],
        out_specs=(
            pl.BlockSpec((blk, XDC_W), lambda b: (b, 0)),
            pl.BlockSpec((blk, LIN_IN), lambda b: (b, 0)),
            pl.BlockSpec((blk, N_OUT), lambda b: (b, 0)),
            pl.BlockSpec((blk, XDL_W), lambda b: (b, 0)),
        ),
        compiler_params=pltpu.CompilerParams(
            dimension_semantics=("parallel",)),
    )(x_aug, s_mat, wc_mat, wz, wl_jac)

    # Batch-major kernel outputs: only a trailing-pad slice + contiguous reshapes.
    xd_conv = xdc_f[:B].reshape(B, N_CONV_PARAMS, N_CHANN, OUT_HW, OUT_HW)
    y_conv = y_f[:B].reshape(B, N_CHANN, OUT_HW, OUT_HW)
    z = z_f[:B]
    xd_lin = xdl_f[:B].reshape(B, N_LIN_PARAMS, N_OUT)

    # TODO(synk): the PyTorch module's print() side effects and the unused
    # MSELoss / Fwd2Rev members are not modeled.
    return z, {'conv1': xd_conv, 'linear': xd_lin}, y_conv


def _reference(x, conv_w, conv_b, lin_w, lin_b):
    y = jax.lax.conv_general_dilated(
        x.astype(jnp.float32), conv_w.astype(jnp.float32),
        window_strides=(1, 1), padding='VALID',
        dimension_numbers=('NCHW', 'OIHW', 'NCHW'))
    y = y + conv_b.reshape(1, -1, 1, 1)
    yf = y.reshape(x.shape[0], -1)
    z = yf @ lin_w.T + lin_b
    return y, z


if __name__ == "__main__":
    key = jax.random.PRNGKey(0)
    kx, kcw, kcb, klw, klb = jax.random.split(key, 5)
    B = 2
    x = jax.random.normal(kx, (B, N_CHANN, IMG, IMG), dtype=jnp.float32)
    conv_w = jax.random.normal(kcw, (N_CHANN, N_CHANN, KS, KS), dtype=jnp.float32) * 0.3
    conv_b = jax.random.normal(kcb, (N_CHANN,), dtype=jnp.float32) * 0.1
    lin_w = jax.random.normal(klw, (N_OUT, LIN_IN), dtype=jnp.float32) * 0.2
    lin_b = jax.random.normal(klb, (N_OUT,), dtype=jnp.float32) * 0.1

    z, xd, y_conv = net_automad_forward(x, conv_w, conv_b, lin_w, lin_b)
    jax.block_until_ready((z, xd, y_conv))

    # primal path vs plain-JAX reference
    y_ref, z_ref = _reference(x, conv_w, conv_b, lin_w, lin_b)
    np.testing.assert_allclose(np.asarray(y_conv), np.asarray(y_ref), rtol=1e-5, atol=1e-5)
    np.testing.assert_allclose(np.asarray(z), np.asarray(z_ref), rtol=1e-5, atol=1e-5)

    # conv layerwise Jacobian: weight dirs = input patches, bias dir = ones
    xd_c = np.asarray(xd['conv1'])
    assert xd_c.shape == (B, N_CONV_PARAMS, N_CHANN, OUT_HW, OUT_HW)
    xn = np.asarray(x)
    for p in range(KS):
        for q in range(KS):
            np.testing.assert_allclose(
                xd_c[:, p * KS + q, 0], xn[:, 0, p:p + OUT_HW, q:q + OUT_HW],
                rtol=1e-5, atol=1e-5)
    np.testing.assert_allclose(xd_c[:, KS * KS, 0],
                               np.ones((B, OUT_HW, OUT_HW), np.float32),
                               rtol=1e-6, atol=1e-6)

    # linear layerwise Jacobian: block-diagonal flattened conv output + identity bias block
    xd_l = np.asarray(xd['linear'])
    assert xd_l.shape == (B, N_LIN_PARAMS, N_OUT)
    yf_ref = np.asarray(y_ref).reshape(B, LIN_IN)
    expect = np.zeros((B, N_LIN_PARAMS, N_OUT), np.float32)
    for o in range(N_OUT):
        expect[:, o * LIN_IN:(o + 1) * LIN_IN, o] = yf_ref
        expect[:, N_OUT * LIN_IN + o, o] = 1.0
    np.testing.assert_allclose(xd_l, expect, rtol=1e-5, atol=1e-5)

    print("KERNEL_OK")
</pallas_src>

<mosaic_0001>
module attributes {stable_mosaic.version = 11 : i64} {
  func.func @_net_kernel(%arg0: i32, %arg1: memref<128x50xf32, #tpu.memory_space<vmem>>, %arg2: memref<50x250xf32, #tpu.memory_space<vmem>>, %arg3: memref<50x25xf32, #tpu.memory_space<vmem>>, %arg4: memref<50x2xf32, #tpu.memory_space<vmem>>, %arg5: memref<50x104xf32, #tpu.memory_space<vmem>>, %arg6: memref<128x250xf32, #tpu.memory_space<vmem>>, %arg7: memref<128x25xf32, #tpu.memory_space<vmem>>, %arg8: memref<128x2xf32, #tpu.memory_space<vmem>>, %arg9: memref<128x104xf32, #tpu.memory_space<vmem>>) attributes {dimension_semantics = [#tpu.dimension_semantics<parallel>], iteration_bounds = array<i64: 1>, scalar_prefetch = 0 : i64, scratch_operands = 0 : i64, tpu.core_type = #tpu.core_type<tc>, window_params = [{transform_indices = @transform_0, window_bounds = array<i64: 128, 50>}, {pipeline_mode = #tpu.pipeline_mode<synchronous>, transform_indices = @transform_1, window_bounds = array<i64: 50, 250>}, {pipeline_mode = #tpu.pipeline_mode<synchronous>, transform_indices = @transform_2, window_bounds = array<i64: 50, 25>}, {pipeline_mode = #tpu.pipeline_mode<synchronous>, transform_indices = @transform_3, window_bounds = array<i64: 50, 2>}, {pipeline_mode = #tpu.pipeline_mode<synchronous>, transform_indices = @transform_4, window_bounds = array<i64: 50, 104>}, {transform_indices = @transform_5, window_bounds = array<i64: 128, 250>}, {transform_indices = @transform_6, window_bounds = array<i64: 128, 25>}, {transform_indices = @transform_7, window_bounds = array<i64: 128, 2>}, {transform_indices = @transform_8, window_bounds = array<i64: 128, 104>}]} {
    %c0 = arith.constant 0 : index
    %c0_0 = arith.constant 0 : index
    %0 = vector.load %arg1[%c0, %c0_0] : memref<128x50xf32, #tpu.memory_space<vmem>>, vector<128x50xf32>
    %c0_1 = arith.constant 0 : index
    %c0_2 = arith.constant 0 : index
    %1 = vector.load %arg2[%c0_1, %c0_2] : memref<50x250xf32, #tpu.memory_space<vmem>>, vector<50x250xf32>
    %cst = arith.constant dense<0.000000e+00> : vector<128x250xf32>
    %2 = tpu.matmul %0, %1, %cst {dimension_numbers = #tpu.dot_dimension_numbers<[1], [0], [0], [1], [0, 0, 1, 1], [], []>} : vector<128x50xf32>, vector<50x250xf32>, vector<128x250xf32> -> vector<128x250xf32>
    %c0_3 = arith.constant 0 : index
    %c0_4 = arith.constant 0 : index
    %3 = vector.load %arg6[%c0_3, %c0_4] : memref<128x250xf32, #tpu.memory_space<vmem>>, vector<128x250xf32>
    tpu.vector_store %arg6[%c0_3, %c0_4], %2 {strides = array<i32>} : memref<128x250xf32, #tpu.memory_space<vmem>>, vector<128x250xf32>,
    %c0_5 = arith.constant 0 : index
    %c0_6 = arith.constant 0 : index
    %4 = vector.load %arg3[%c0_5, %c0_6] : memref<50x25xf32, #tpu.memory_space<vmem>>, vector<50x25xf32>
    %cst_7 = arith.constant dense<0.000000e+00> : vector<128x25xf32>
    %5 = tpu.matmul %0, %4, %cst_7 {dimension_numbers = #tpu.dot_dimension_numbers<[1], [0], [0], [1], [0, 0, 1, 1], [], []>} : vector<128x50xf32>, vector<50x25xf32>, vector<128x25xf32> -> vector<128x25xf32>
    %c0_8 = arith.constant 0 : index
    %c0_9 = arith.constant 0 : index
    %6 = vector.load %arg7[%c0_8, %c0_9] : memref<128x25xf32, #tpu.memory_space<vmem>>, vector<128x25xf32>
    tpu.vector_store %arg7[%c0_8, %c0_9], %5 {strides = array<i32>} : memref<128x25xf32, #tpu.memory_space<vmem>>, vector<128x25xf32>,
    %c0_10 = arith.constant 0 : index
    %c0_11 = arith.constant 0 : index
    %7 = vector.load %arg4[%c0_10, %c0_11] : memref<50x2xf32, #tpu.memory_space<vmem>>, vector<50x2xf32>
    %cst_12 = arith.constant dense<0.000000e+00> : vector<128x2xf32>
    %8 = tpu.matmul %0, %7, %cst_12 {dimension_numbers = #tpu.dot_dimension_numbers<[1], [0], [0], [1], [0, 0, 1, 1], [], []>} : vector<128x50xf32>, vector<50x2xf32>, vector<128x2xf32> -> vector<128x2xf32>
    %c0_13 = arith.constant 0 : index
    %c0_14 = arith.constant 0 : index
    %9 = vector.load %arg8[%c0_13, %c0_14] : memref<128x2xf32, #tpu.memory_space<vmem>>, vector<128x2xf32>
    tpu.vector_store %arg8[%c0_13, %c0_14], %8 {strides = array<i32>} : memref<128x2xf32, #tpu.memory_space<vmem>>, vector<128x2xf32>,
    %c0_15 = arith.constant 0 : index
    %c0_16 = arith.constant 0 : index
    %10 = vector.load %arg5[%c0_15, %c0_16] : memref<50x104xf32, #tpu.memory_space<vmem>>, vector<50x104xf32>
    %cst_17 = arith.constant dense<0.000000e+00> : vector<128x104xf32>
    %11 = tpu.matmul %0, %10, %cst_17 {dimension_numbers = #tpu.dot_dimension_numbers<[1], [0], [0], [1], [0, 0, 1, 1], [], []>} : vector<128x50xf32>, vector<50x104xf32>, vector<128x104xf32> -> vector<128x104xf32>
    %c0_18 = arith.constant 0 : index
    %c0_19 = arith.constant 0 : index
    %12 = vector.load %arg9[%c0_18, %c0_19] : memref<128x104xf32, #tpu.memory_space<vmem>>, vector<128x104xf32>
    tpu.vector_store %arg9[%c0_18, %c0_19], %11 {strides = array<i32>} : memref<128x104xf32, #tpu.memory_space<vmem>>, vector<128x104xf32>,
    return
  }
  func.func @transform_0(%arg0: i32) -> (i32, i32) {
    %c0_i32 = arith.constant 0 : i32
    %c0_i32_0 = arith.constant 0 : i32
    return %arg0, %c0_i32 : i32, i32
  }
  func.func @transform_1(%arg0: i32) -> (i32, i32) {
    %c0_i32 = arith.constant 0 : i32
    %c0_i32_0 = arith.constant 0 : i32
    %c0_i32_1 = arith.constant 0 : i32
    return %c0_i32, %c0_i32_0 : i32, i32
  }
  func.func @transform_2(%arg0: i32) -> (i32, i32) {
    %c0_i32 = arith.constant 0 : i32
    %c0_i32_0 = arith.constant 0 : i32
    %c0_i32_1 = arith.constant 0 : i32
    return %c0_i32, %c0_i32_0 : i32, i32
  }
  func.func @transform_3(%arg0: i32) -> (i32, i32) {
    %c0_i32 = arith.constant 0 : i32
    %c0_i32_0 = arith.constant 0 : i32
    %c0_i32_1 = arith.constant 0 : i32
    return %c0_i32, %c0_i32_0 : i32, i32
  }
  func.func @transform_4(%arg0: i32) -> (i32, i32) {
    %c0_i32 = arith.constant 0 : i32
    %c0_i32_0 = arith.constant 0 : i32
    %c0_i32_1 = arith.constant 0 : i32
    return %c0_i32, %c0_i32_0 : i32, i32
  }
  func.func @transform_5(%arg0: i32) -> (i32, i32) {
    %c0_i32 = arith.constant 0 : i32
    %c0_i32_0 = arith.constant 0 : i32
    return %arg0, %c0_i32 : i32, i32
  }
  func.func @transform_6(%arg0: i32) -> (i32, i32) {
    %c0_i32 = arith.constant 0 : i32
    %c0_i32_0 = arith.constant 0 : i32
    return %arg0, %c0_i32 : i32, i32
  }
  func.func @transform_7(%arg0: i32) -> (i32, i32) {
    %c0_i32 = arith.constant 0 : i32
    %c0_i32_0 = arith.constant 0 : i32
    return %arg0, %c0_i32 : i32, i32
  }
  func.func @transform_8(%arg0: i32) -> (i32, i32) {
    %c0_i32 = arith.constant 0 : i32
    %c0_i32_0 = arith.constant 0 : i32
    return %arg0, %c0_i32 : i32, i32
  }
}

</mosaic_0001>

<bundles_post_ra>
// kernel: tpu_custom_call.1
= control target key start
LH: loop header
LB: loop body
LE: loop exit
PB: predicated region body
PF: predicated region fallthrough
CT: control target
= control target key end

     0   :  { %v1185_v7 = vmov 0.0   ;;  %vm104_vm0 = vcmask 1041408   ;;  %vm55_vm1 = vcmask 408576   ;;  %s1751_s0 = inlined_call_operand.vmem [shape: f32[128,50], index: 0, kind: input, shape index: {}]   ;;  %s1752_s1 = inlined_call_operand.vmem [shape: f32[50,250], index: 1, kind: input, shape index: {}]   ;;  %s1753_s2 = inlined_call_operand.vmem [shape: f32[50,25], index: 2, kind: input, shape index: {}]   ;;  %s1754_s3 = inlined_call_operand.vmem [shape: f32[50,2], index: 3, kind: input, shape index: {}]   ;;  %s1755_s4 = inlined_call_operand.vmem [shape: f32[50,104], index: 4, kind: input, shape index: {}]   ;;  %s1756_s5 = inlined_call_operand.hbm [shape: f32[128,250], index: 5, kind: output, shape index: {0}]   ;;  %s1757_s6 = inlined_call_operand.vmem [shape: f32[128,25], index: 6, kind: output, shape index: {1}]   ;;  %s1758_s7 = inlined_call_operand.vmem [shape: f32[128,2], index: 7, kind: output, shape index: {2}]   ;;  %s1759_s8 = inlined_call_operand.vmem [shape: f32[128,104], index: 8, kind: output, shape index: {3}]  }
   0x1   :  { %v42_v0 = vld [vmem:[%s1752_s1 + $0x8] sm:$0xff]  ;;  %v44_v1 = vld [vmem:[%s1752_s1 + $0x18] sm:$0xff]  ;;  %v41_v2 = vld [vmem:[%s1752_s1] sm:$0xff]  ;;  %175 = vmatprep.mubr.f32.mxu0 %v1185_v7  ;;  %247 = vmatprep.mubr.f32.mxu1 %v1185_v7 }
   0x2   :  { %v1101_v3 = vpack.c.bf16 %v44_v1, %v42_v0  ;;  %v43_v4 = vld [vmem:[%s1752_s1 + $0x10] sm:$0xff]  ;;  %v46_v5 = vld [vmem:[%s1752_s1 + $0x28] sm:$0xff]  ;;  %v48_v6 = vld [vmem:[%s1752_s1 + $0x38] sm:$0xff] }
   0x3   :  { %v1103_v8 = vpack.c.bf16 %v43_v4, %v41_v2  ;;  %v1105_v9 = vpack.c.bf16 %v48_v6, %v46_v5  ;;  %v45_v10 = vld [vmem:[%s1752_s1 + $0x20] sm:$0xff]  ;;  %v47_v11 = vld [vmem:[%s1752_s1 + $0x30] sm:$0xff]  ;;  %v50_v12 = vld [vmem:[%s1752_s1 + $0x48] sm:$0xff] }
   0x4   :  { %1102 = vmatprep.subr.bf16.mxu0 %v1101_v3  ;;  %1149 = vmatprep.subr.bf16.mxu1 %v1101_v3  ;;  %v52_v13 = vld [vmem:[%s1752_s1 + $0x58] sm:$0xff]  ;;  %v1107_v14 = vpack.c.bf16 %v47_v11, %v45_v10  ;;  %v49_v16 = vld [vmem:[%s1752_s1 + $0x40] sm:$0xff]  ;;  %v51_v17 = vld [vmem:[%s1752_s1 + $0x50] sm:$0xff] }
   0x5   :  { %1104 = vmatpush1.bf16.msra.mxu0 %v1103_v8  ;;  %1153 = vmatpush1.bf16.msra.mxu1 %v1103_v8  ;;  %v1109_v15 = vpack.c.bf16 %v52_v13, %v50_v12  ;;  %v1111_v18 = vpack.c.bf16 %v51_v17, %v49_v16  ;;  %v54_v19 = vld [vmem:[%s1752_s1 + $0x68] sm:$0x3]  ;;  %v305_v20 = vld [vmem:[%s1753_s2] sm:$0xff]  ;;  %v307_v29 = vld [vmem:[%s1753_s2 + $0x10] sm:$0xff] }
   0x6   :  { %1106 = vmatprep.subr.bf16.mxu0 %v1105_v9  ;;  %1150 = vmatprep.subr.bf16.mxu1 %v1105_v9  ;;  %v306_v21 = vld [vmem:[%s1753_s2 + $0x8] sm:$0xff]  ;;  %v649_v22 = vld [vmem:[%s1755_s4] sm:$0xff]  ;;  %v308_v30 = vld [vmem:[%s1753_s2 + $0x18] sm:$0xff] }
   0x7   :  { %v650_v23 = vld [vmem:[%s1755_s4 + $0x8] sm:$0xff]  ;;  %v53_v24 = vld [vmem:[%s1752_s1 + $0x60] sm:$0x3]  ;;  %v1113_v27 = vpack.c.bf16 %v306_v21, %v305_v20  ;;  %v651_v33 = vld [vmem:[%s1755_s4 + $0x10] sm:$0xff] }
   0x8   :  { %v1295_v25 = vld [vmem:[%s1751_s0] sm:$0xff]  ;;  %v1137_v28 = vpack.c.bf16 %v650_v23, %v649_v22  ;;  %v310_v32 = vld [vmem:[%s1753_s2 + $0x28] sm:$0xff]  ;;  %v652_v34 = vld [vmem:[%s1755_s4 + $0x18] sm:$0xff] }
   0x9   :  { %1108 = vmatpush1.bf16.msra.mxu0 %v1107_v14  ;;  %1154 = vmatpush1.bf16.msra.mxu1 %v1107_v14  ;;  %v1300_v26 = vld [vmem:[%s1751_s0 + $0x60] sm:$0xff] }
   0xa   :  { %1110 = vmatprep.subr.bf16.mxu0 %v1109_v15  ;;  %1151 = vmatprep.subr.bf16.mxu1 %v1109_v15  ;;  %v309_v31 = vld [vmem:[%s1753_s2 + $0x20] sm:$0xff] }
   0xd   :  { %1112 = vmatpush1.bf16.msra.mxu0 %v1111_v18  ;;  %1155 = vmatpush1.bf16.msra.mxu1 %v1111_v18 }
   0xe   :  { %849 = vmatprep.subr.msk.mxu0 %vm104_vm0, %v54_v19  ;;  %1152 = vmatprep.subr.msk.mxu1 %vm104_vm0, %v54_v19 }
  0x11   :  { %850 = vmatpush1.msk.msra.mxu0 %vm104_vm0, %v53_v24  ;;  %1156 = vmatpush1.msk.msra.mxu1 %vm104_vm0, %v53_v24 }
  0x12   :  { %851 = vmatmul.mubr.msk.f32.vlgmr.msra.gmra.mrb[0].mxu0 %vm55_vm1, %v1295_v25  ;;  %863 = vmatmul.mubr.msk.f32.vlgmr.msra.gmra.mrb[0].mxu1 %vm55_vm1, %v1300_v26 }
  0x13   :  { %14 = vsyncpa [#allocation3], 0  ;;  %1114 = vmatprep.subr.bf16.mxu1 %v1113_v27  ;;  %1138 = vmatprep.subr.bf16.mxu0 %v1137_v28  ;;  %v1329_v35 = vld [vmem:[%s1751_s0 + $0x8] sm:$0xff]  ;;  %v1117_v37 = vpack.c.bf16 %v308_v30, %v307_v29  ;;  %v1121_v38 = vpack.c.bf16 %v310_v32, %v309_v31  ;;  %v1141_v39 = vpack.c.bf16 %v652_v34, %v651_v33  ;;  %v653_v40 = vld [vmem:[%s1755_s4 + $0x20] sm:$0xff]  ;;  %vm273_vm2 = vcmask 998400   ;;  %s1186_s10 = smov [#allocation2]  }
  0x14   :  { %v1334_v36 = vld [vmem:[%s1751_s0 + $0x68] sm:$0xff]  ;;  %1116 = vmatpush3.bf16.msra.mxu1 %v1113_v27  ;;  %1140 = vmatpush3.bf16.msra.mxu0 %v1137_v28  ;;  %v1352_v42 = vld [vmem:[%s1751_s0 + $0x10] sm:$0xff]  ;;  %v477_v46 = vld [vmem:[%s1754_s3] sm:$0xff]  ;;  %vm460_vm3 = vcmask 203776   ;;  %vm632_vm4 = vcmask 15360   ;;  %vm804_vm5 = vcmask 850944  }
  0x15   :  { %181 = vmatprep.mubr.f32.mxu0 %v1185_v7  ;;  %253 = vmatprep.mubr.f32.mxu1 %v1185_v7  ;;  %v654_v41 = vld [vmem:[%s1755_s4 + $0x28] sm:$0xff]  ;;  %v1357_v43 = vld [vmem:[%s1751_s0 + $0x70] sm:$0xff]  ;;  %v1378_v48 = vld [vmem:[%s1751_s0 + $0x18] sm:$0xff] }
  0x16   :  { %852 = vmatmul.mubr.msk.f32.gmra.mrb[2].mxu0 %vm55_vm1, %v1329_v35  ;;  %864 = vmatmul.mubr.msk.f32.gmra.mrb[2].mxu1 %vm55_vm1, %v1334_v36  ;;  %v1145_v44 = vpack.c.bf16 %v654_v41, %v653_v40  ;;  %v311_v45 = vld [vmem:[%s1753_s2 + $0x30] sm:$0x3]  ;;  %v478_v47 = vld [vmem:[%s1754_s3 + $0x8] sm:$0xff]  ;;  %v1383_v49 = vld [vmem:[%s1751_s0 + $0x78] sm:$0xff]  ;;  %s826_s2 = sshll.u32 %s1186_s10, 4  ;;  %s827_s2 = int_to_ptr.vmem [resolvable:$true] %s826_s2 }
  0x17   :  { %1118 = vmatprep.subr.bf16.mxu1 %v1117_v37  ;;  %187 = vmatprep.mubr.f32.mxu0 %v1185_v7  ;;  %v1125_v50 = vpack.c.bf16 %v478_v47, %v477_v46  ;;  %v479_v51 = vld [vmem:[%s1754_s3 + $0x10] sm:$0xff]  ;;  %v480_v52 = vld [vmem:[%s1754_s3 + $0x18] sm:$0xff]  ;;  %v1405_v54 = vld [vmem:[%s1751_s0 + $0x20] sm:$0xff]  ;;  %p1166_p1 = scmp.lt.s32.totalorder %s827_s2, %s827_s2 }
  0x18   :  { %1120 = vmatpush3.bf16.msra.mxu1 %v1117_v37  ;;  %259 = vmatprep.mubr.f32.mxu1 %v1185_v7  ;;  %v655_v53 = vld [vmem:[%s1755_s4 + $0x30] sm:$0x3]  ;;  %v1129_v55 = vpack.c.bf16 %v480_v52, %v479_v51  ;;  %v481_v56 = vld [vmem:[%s1754_s3 + $0x20] sm:$0xff]  ;;  %v482_v57 = vld [vmem:[%s1754_s3 + $0x28] sm:$0xff]  ;;  %s1161_s4 = scalar_lea.vmem %s827_s2, 4096 }
  0x19   :  { %1122 = vmatprep.subr.bf16.mxu1 %v1121_v38  ;;  %1142 = vmatprep.subr.bf16.mxu0 %v1141_v39  ;;  %v30_v58 = vld [vmem:[%s1751_s0 + $0x28] sm:$0xff]  ;;  %v1133_v59 = vpack.c.bf16 %v482_v57, %v481_v56  ;;  %v31_v60 = vld [vmem:[%s1751_s0 + $0x30] sm:$0xff]  ;;  %v32_v62 = vld [vmem:[%s1751_s0 + $0x38] sm:$0xff]  ;;  %p1162_p0 = scmp.ne.s32.totalorder %s827_s2, %s1161_s4  ;;  %p1167_p2 = scmp.lt.s32.totalorder %s1161_s4, %s1161_s4 }
  0x1a   :  { %853 = vmatmul.mubr.msk.f32.gmra.mrb[4].mxu0 %vm55_vm1, %v1352_v42  ;;  %865 = vmatmul.mubr.msk.f32.gmra.mrb[4].mxu1 %vm55_vm1, %v1357_v43  ;;  %v483_v61 = vld [vmem:[%s1754_s3 + $0x30] sm:$0x3]  ;;  %v33_v63 = vld [vmem:[%s1751_s0 + $0x40] sm:$0xff]  ;;  %v34_v0 = vld [vmem:[%s1751_s0 + $0x48] sm:$0xff] }
  0x1b   :  { %193 = vmatprep.mubr.f32.mxu0 %v1185_v7  ;;  %265 = vmatprep.mubr.f32.mxu1 %v1185_v7  ;;  %v35_v1 = vld [vmem:[%s1751_s0 + $0x50] sm:$0xff]  ;;  %v36_v2 = vld [vmem:[%s1751_s0 + $0x58] sm:$0xff]  ;;  %p1168_p3 = por %p1167_p2, %p1166_p1 }
  0x1c   :  { %1124 = vmatpush3.bf16.msra.mxu1 %v1121_v38  ;;  %1144 = vmatpush3.bf16.msra.mxu0 %v1141_v39 }
  0x1d   :  { %999 = vmatprep.subr.msk.mxu1 %vm104_vm0, %v311_v45  ;;  %1146 = vmatprep.subr.bf16.mxu0 %v1145_v44  ;;  %p1169_p4 = pnand %p1168_p3, %p1162_p0 }
  0x1e   :  { %854 = vmatmul.mubr.msk.f32.gmra.mrb[6].mxu0 %vm55_vm1, %v1378_v48  ;;  %866 = vmatmul.mubr.msk.f32.gmra.mrb[6].mxu1 %vm55_vm1, %v1383_v49 }
  0x1f   :  { %199 = vmatprep.mubr.f32.mxu0 %v1185_v7  ;;  %1001 = vmatprep.mubr.msk.f32.mxu1 %vm55_vm1, %v1295_v25 }
  0x20   :  { %1000 = vmatpush3.msk.msra.mxu1 %vm104_vm0, %v311_v45  ;;  %1148 = vmatpush3.bf16.msra.mxu0 %v1145_v44 }
  0x21   :  { %1126 = vmatprep.subr.bf16.mxu1 %v1125_v50  ;;  %1075 = vmatprep.subr.msk.mxu0 %vm104_vm0, %v655_v53 }
  0x22   :  { %855 = vmatmul.mubr.msk.f32.gmra.mrb[8].mxu0 %vm55_vm1, %v1405_v54  ;;  %1002 = vmatmul.mubr.msk.f32.vlgmr.msra.gmra.mrb[8].mxu1 %vm55_vm1, %v1329_v35 }
  0x23   :  { %1128 = vmatpush3.bf16.msra.mxu1 %v1125_v50  ;;  %205 = vmatprep.mubr.f32.mxu0 %v1185_v7 }
  0x24   :  { %1004 = vmatprep.mubr.msk.f32.mxu1 %vm55_vm1, %v1352_v42  ;;  %1130 = vmatprep.subr.bf16.mxu1 %v1129_v55 }
  0x25   :  { %1076 = vmatpush3.msk.msra.mxu0 %vm104_vm0, %v655_v53 }
  0x26   :  { %856 = vmatmul.mubr.msk.f32.gmra.mrb[10].mxu0 %vm55_vm1, %v30_v58  ;;  %1005 = vmatmul.mubr.msk.f32.gmra.mrb[10].mxu1 %vm55_vm1, %v1378_v48 }
  0x27   :  { %211 = vmatprep.mubr.f32.mxu0 %v1185_v7  ;;  %1007 = vmatprep.mubr.msk.f32.mxu1 %vm55_vm1, %v1405_v54 }
  0x28   :  { %1132 = vmatpush3.bf16.msra.mxu1 %v1129_v55 }
  0x29   :  { %1134 = vmatprep.subr.bf16.mxu1 %v1133_v59 }
  0x2a   :  { %857 = vmatmul.mubr.msk.f32.gmra.mrb[12].mxu0 %vm55_vm1, %v31_v60  ;;  %1008 = vmatmul.mubr.msk.f32.gmra.mrb[12].mxu1 %vm55_vm1, %v30_v58 }
  0x2b   :  { %217 = vmatprep.mubr.f32.mxu0 %v1185_v7  ;;  %1010 = vmatprep.mubr.msk.f32.mxu1 %vm55_vm1, %v31_v60 }
  0x2c   :  { %1136 = vmatpush3.bf16.msra.mxu1 %v1133_v59 }
  0x2d   :  { %1037 = vmatprep.subr.msk.mxu1 %vm104_vm0, %v483_v61 }
  0x2e   :  { %858 = vmatmul.mubr.msk.f32.gmra.mrb[14].mxu0 %vm55_vm1, %v32_v62  ;;  %1011 = vmatmul.mubr.msk.f32.gmra.mrb[14].mxu1 %vm55_vm1, %v32_v62 }
  0x2f   :  { %223 = vmatprep.mubr.f32.mxu0 %v1185_v7  ;;  %1013 = vmatprep.mubr.msk.f32.mxu1 %vm55_vm1, %v33_v63 }
  0x30   :  { %1038 = vmatpush3.msk.msra.mxu1 %vm104_vm0, %v483_v61 }
  0x32   :  { %859 = vmatmul.mubr.msk.f32.gmra.mrb[16].mxu0 %vm55_vm1, %v33_v63  ;;  %1014 = vmatmul.mubr.msk.f32.gmra.mrb[16].mxu1 %vm55_vm1, %v34_v0 }
  0x33   :  { %229 = vmatprep.mubr.f32.mxu0 %v1185_v7  ;;  %1016 = vmatprep.mubr.msk.f32.mxu1 %vm55_vm1, %v35_v1 }
  0x36   :  { %860 = vmatmul.mubr.msk.f32.gmra.mrb[18].mxu0 %vm55_vm1, %v34_v0  ;;  %1017 = vmatmul.mubr.msk.f32.gmra.mrb[18].mxu1 %vm55_vm1, %v36_v2 }
  0x37   :  { %235 = vmatprep.mubr.f32.mxu0 %v1185_v7  ;;  %1019 = vmatprep.mubr.msk.f32.mxu1 %vm55_vm1, %v1300_v26 }
  0x3a   :  { %861 = vmatmul.mubr.msk.f32.gmra.mrb[20].mxu0 %vm55_vm1, %v35_v1  ;;  %1020 = vmatmul.mubr.msk.f32.gmra.mrb[20].mxu1 %vm55_vm1, %v1334_v36 }
  0x3b   :  { %241 = vmatprep.mubr.f32.mxu0 %v1185_v7  ;;  %1022 = vmatprep.mubr.msk.f32.mxu1 %vm55_vm1, %v1357_v43 }
  0x3e   :  { %862 = vmatmul.mubr.msk.f32.gmra.mrb[22].mxu0 %vm55_vm1, %v36_v2  ;;  %1023 = vmatmul.mubr.msk.f32.gmra.mrb[22].mxu1 %vm55_vm1, %v1383_v49 }
  0x3f   :  { %1039 = vmatprep.mubr.msk.f32.mxu1 %vm55_vm1, %v1295_v25  ;;  %1077 = vmatprep.mubr.msk.f32.mxu0 %vm55_vm1, %v1295_v25 }
  0x42   :  { %1040 = vmatmul.mubr.msk.f32.vlgmr.msra.gmra.mrb[24].mxu1 %vm55_vm1, %v1329_v35  ;;  %1078 = vmatmul.mubr.msk.f32.vlgmr.msra.gmra.mrb[24].mxu0 %vm55_vm1, %v1329_v35 }
  0x43   :  { %1042 = vmatprep.mubr.msk.f32.mxu1 %vm55_vm1, %v1352_v42  ;;  %1080 = vmatprep.mubr.msk.f32.mxu0 %vm55_vm1, %v1352_v42 }
  0x46   :  { %1043 = vmatmul.mubr.msk.f32.gmra.mrb[26].mxu1 %vm55_vm1, %v1378_v48  ;;  %1081 = vmatmul.mubr.msk.f32.gmra.mrb[26].mxu0 %vm55_vm1, %v1378_v48 }
  0x47   :  { %1045 = vmatprep.mubr.msk.f32.mxu1 %vm55_vm1, %v1405_v54  ;;  %1083 = vmatprep.mubr.msk.f32.mxu0 %vm55_vm1, %v1405_v54 }
  0x4a   :  { %1046 = vmatmul.mubr.msk.f32.gmra.mrb[28].mxu1 %vm55_vm1, %v30_v58  ;;  %1084 = vmatmul.mubr.msk.f32.gmra.mrb[28].mxu0 %vm55_vm1, %v30_v58 }
  0x4b   :  { %1048 = vmatprep.mubr.msk.f32.mxu1 %vm55_vm1, %v31_v60  ;;  %1086 = vmatprep.mubr.msk.f32.mxu0 %vm55_vm1, %v31_v60 }
  0x4e   :  { %1049 = vmatmul.mubr.msk.f32.gmra.mrb[30].mxu1 %vm55_vm1, %v32_v62  ;;  %1087 = vmatmul.mubr.msk.f32.gmra.mrb[30].mxu0 %vm55_vm1, %v32_v62 }
  0x4f   :  { %1051 = vmatprep.mubr.msk.f32.mxu1 %vm55_vm1, %v33_v63  ;;  %1089 = vmatprep.mubr.msk.f32.mxu0 %vm55_vm1, %v33_v63 }
  0x52   :  { %1052 = vmatmul.mubr.msk.f32.gmra.mrb[32].mxu1 %vm55_vm1, %v34_v0  ;;  %1090 = vmatmul.mubr.msk.f32.gmra.mrb[32].mxu0 %vm55_vm1, %v34_v0 }
  0x53   :  { %1054 = vmatprep.mubr.msk.f32.mxu1 %vm55_vm1, %v35_v1  ;;  %1092 = vmatprep.mubr.msk.f32.mxu0 %vm55_vm1, %v35_v1 }
  0x56   :  { %1055 = vmatmul.mubr.msk.f32.gmra.mrb[34].mxu1 %vm55_vm1, %v36_v2  ;;  %1093 = vmatmul.mubr.msk.f32.gmra.mrb[34].mxu0 %vm55_vm1, %v36_v2 }
  0x57   :  { %1057 = vmatprep.mubr.msk.f32.mxu1 %vm55_vm1, %v1300_v26  ;;  %1095 = vmatprep.mubr.msk.f32.mxu0 %vm55_vm1, %v1300_v26 }
  0x5a   :  { %1058 = vmatmul.mubr.msk.f32.gmra.mrb[36].mxu1 %vm55_vm1, %v1334_v36  ;;  %1096 = vmatmul.mubr.msk.f32.gmra.mrb[36].mxu0 %vm55_vm1, %v1334_v36 }
  0x5b   :  { %1060 = vmatprep.mubr.msk.f32.mxu1 %vm55_vm1, %v1357_v43  ;;  %1098 = vmatprep.mubr.msk.f32.mxu0 %vm55_vm1, %v1357_v43 }
  0x5e   :  { %1061 = vmatmul.mubr.msk.f32.gmra.mrb[38].mxu1 %vm55_vm1, %v1383_v49  ;;  %1099 = vmatmul.mubr.msk.f32.gmra.mrb[38].mxu0 %vm55_vm1, %v1383_v49 }
  0xe5   :  { %v177_v3 = vpop.f32.mrb[0].mxu0  ;;  %v249_v4 = vpop.f32.mrb[0].mxu1 }
  0xe6   :  { %272 = vst [vmem:[#allocation2] sm:$0xff] %v177_v3  ;;  %297 = vst [vmem:[#allocation2 + $0xc0] sm:$0xff] %v249_v4  ;;  %v179_v5 = vpop.f32.mrb[1].mxu0  ;;  %v251_v6 = vpop.f32.mrb[1].mxu1 }
  0xe7   :  { %274 = vst.msk [vmem:[#allocation2 + $0x8] sm:$0xff] %vm273_vm2, %v179_v5  ;;  %298 = vst.msk [vmem:[#allocation2 + $0xc8] sm:$0xff] %vm273_vm2, %v251_v6 }
  0xe9   :  { %v183_v7 = vpop.f32.mrb[2].mxu0  ;;  %v255_v8 = vpop.f32.mrb[2].mxu1 }
  0xea   :  { %275 = vst [vmem:[#allocation2 + $0x10] sm:$0xff] %v183_v7  ;;  %299 = vst [vmem:[#allocation2 + $0xd0] sm:$0xff] %v255_v8  ;;  %v185_v9 = vpop.f32.mrb[3].mxu0  ;;  %v257_v10 = vpop.f32.mrb[3].mxu1 }
  0xeb   :  { %276 = vst.msk [vmem:[#allocation2 + $0x18] sm:$0xff] %vm273_vm2, %v185_v9  ;;  %300 = vst.msk [vmem:[#allocation2 + $0xd8] sm:$0xff] %vm273_vm2, %v257_v10 }
  0xed   :  { %v189_v11 = vpop.f32.mrb[4].mxu0  ;;  %v261_v12 = vpop.f32.mrb[4].mxu1 }
  0xee   :  { %277 = vst [vmem:[#allocation2 + $0x20] sm:$0xff] %v189_v11  ;;  %301 = vst [vmem:[#allocation2 + $0xe0] sm:$0xff] %v261_v12  ;;  %v191_v13 = vpop.f32.mrb[5].mxu0  ;;  %v263_v14 = vpop.f32.mrb[5].mxu1 }
  0xef   :  { %278 = vst.msk [vmem:[#allocation2 + $0x28] sm:$0xff] %vm273_vm2, %v191_v13  ;;  %302 = vst.msk [vmem:[#allocation2 + $0xe8] sm:$0xff] %vm273_vm2, %v263_v14 }
  0xf1   :  { %v195_v15 = vpop.f32.mrb[6].mxu0  ;;  %v267_v16 = vpop.f32.mrb[6].mxu1 }
  0xf2   :  { %279 = vst [vmem:[#allocation2 + $0x30] sm:$0xff] %v195_v15  ;;  %303 = vst [vmem:[#allocation2 + $0xf0] sm:$0xff] %v267_v16  ;;  %v197_v17 = vpop.f32.mrb[7].mxu0  ;;  %v269_v18 = vpop.f32.mrb[7].mxu1 }
  0xf3   :  { %280 = vst.msk [vmem:[#allocation2 + $0x38] sm:$0xff] %vm273_vm2, %v197_v17  ;;  %304 = vst.msk [vmem:[#allocation2 + $0xf8] sm:$0xff] %vm273_vm2, %v269_v18 }
  0xf5   :  { %v201_v19 = vpop.f32.mrb[8].mxu0  ;;  %v1003_v20 = vpop.f32.mrb[8].mxu1 }
  0xf6   :  { %281 = vst [vmem:[#allocation2 + $0x40] sm:$0xff] %v201_v19  ;;  %462 = vst.msk [vmem:[%s1757_s6 + $0x8] sm:$0xff] %vm460_vm3, %v1003_v20  ;;  %v203_v21 = vpop.f32.mrb[9].mxu0  ;;  %v381_v22 = vpop.f32.mrb[9].mxu1 }
  0xf7   :  { %282 = vst.msk [vmem:[#allocation2 + $0x48] sm:$0xff] %vm273_vm2, %v203_v21 }
  0xf8   :  { %461 = vst.msk [vmem:[%s1757_s6] sm:$0xff] %vm460_vm3, %v381_v22 }
  0xf9   :  { %v207_v23 = vpop.f32.mrb[10].mxu0  ;;  %v1006_v24 = vpop.f32.mrb[10].mxu1 }
  0xfa   :  { %283 = vst [vmem:[#allocation2 + $0x50] sm:$0xff] %v207_v23  ;;  %464 = vst.msk [vmem:[%s1757_s6 + $0x18] sm:$0xff] %vm460_vm3, %v1006_v24  ;;  %v209_v25 = vpop.f32.mrb[11].mxu0  ;;  %v391_v26 = vpop.f32.mrb[11].mxu1 }
  0xfb   :  { %284 = vst.msk [vmem:[#allocation2 + $0x58] sm:$0xff] %vm273_vm2, %v209_v25 }
  0xfc   :  { %463 = vst.msk [vmem:[%s1757_s6 + $0x10] sm:$0xff] %vm460_vm3, %v391_v26 }
  0xfd   :  { %v213_v27 = vpop.f32.mrb[12].mxu0  ;;  %v1009_v28 = vpop.f32.mrb[12].mxu1 }
  0xfe   :  { %285 = vst [vmem:[#allocation2 + $0x60] sm:$0xff] %v213_v27  ;;  %466 = vst.msk [vmem:[%s1757_s6 + $0x28] sm:$0xff] %vm460_vm3, %v1009_v28  ;;  %v215_v29 = vpop.f32.mrb[13].mxu0  ;;  %v401_v30 = vpop.f32.mrb[13].mxu1 }
  0xff   :  { %286 = vst.msk [vmem:[#allocation2 + $0x68] sm:$0xff] %vm273_vm2, %v215_v29 }
 0x100   :  { %465 = vst.msk [vmem:[%s1757_s6 + $0x20] sm:$0xff] %vm460_vm3, %v401_v30 }
 0x101   :  { %v219_v31 = vpop.f32.mrb[14].mxu0  ;;  %v1012_v32 = vpop.f32.mrb[14].mxu1 }
 0x102   :  { %287 = vst [vmem:[#allocation2 + $0x70] sm:$0xff] %v219_v31  ;;  %468 = vst.msk [vmem:[%s1757_s6 + $0x38] sm:$0xff] %vm460_vm3, %v1012_v32  ;;  %v221_v33 = vpop.f32.mrb[15].mxu0  ;;  %v411_v34 = vpop.f32.mrb[15].mxu1 }
 0x103   :  { %288 = vst.msk [vmem:[#allocation2 + $0x78] sm:$0xff] %vm273_vm2, %v221_v33 }
 0x104   :  { %467 = vst.msk [vmem:[%s1757_s6 + $0x30] sm:$0xff] %vm460_vm3, %v411_v34 }
 0x105   :  { %v225_v35 = vpop.f32.mrb[16].mxu0  ;;  %v1015_v36 = vpop.f32.mrb[16].mxu1 }
 0x106   :  { %289 = vst [vmem:[#allocation2 + $0x80] sm:$0xff] %v225_v35  ;;  %470 = vst.msk [vmem:[%s1757_s6 + $0x48] sm:$0xff] %vm460_vm3, %v1015_v36  ;;  %v227_v37 = vpop.f32.mrb[17].mxu0  ;;  %v421_v38 = vpop.f32.mrb[17].mxu1 }
 0x107   :  { %290 = vst.msk [vmem:[#allocation2 + $0x88] sm:$0xff] %vm273_vm2, %v227_v37 }
 0x108   :  { %469 = vst.msk [vmem:[%s1757_s6 + $0x40] sm:$0xff] %vm460_vm3, %v421_v38 }
 0x109   :  { %v231_v39 = vpop.f32.mrb[18].mxu0  ;;  %v1018_v40 = vpop.f32.mrb[18].mxu1 }
 0x10a   :  { %291 = vst [vmem:[#allocation2 + $0x90] sm:$0xff] %v231_v39  ;;  %472 = vst.msk [vmem:[%s1757_s6 + $0x58] sm:$0xff] %vm460_vm3, %v1018_v40  ;;  %v233_v41 = vpop.f32.mrb[19].mxu0  ;;  %v431_v42 = vpop.f32.mrb[19].mxu1 }
 0x10b   :  { %292 = vst.msk [vmem:[#allocation2 + $0x98] sm:$0xff] %vm273_vm2, %v233_v41 }
 0x10c   :  { %471 = vst.msk [vmem:[%s1757_s6 + $0x50] sm:$0xff] %vm460_vm3, %v431_v42 }
 0x10d   :  { %v237_v43 = vpop.f32.mrb[20].mxu0  ;;  %v1021_v44 = vpop.f32.mrb[20].mxu1 }
 0x10e   :  { %293 = vst [vmem:[#allocation2 + $0xa0] sm:$0xff] %v237_v43  ;;  %474 = vst.msk [vmem:[%s1757_s6 + $0x68] sm:$0xff] %vm460_vm3, %v1021_v44  ;;  %v239_v45 = vpop.f32.mrb[21].mxu0  ;;  %v441_v46 = vpop.f32.mrb[21].mxu1 }
 0x10f   :  { %294 = vst.msk [vmem:[#allocation2 + $0xa8] sm:$0xff] %vm273_vm2, %v239_v45 }
 0x110   :  { %473 = vst.msk [vmem:[%s1757_s6 + $0x60] sm:$0xff] %vm460_vm3, %v441_v46 }
 0x111   :  { %v243_v47 = vpop.f32.mrb[22].mxu0  ;;  %v1024_v48 = vpop.f32.mrb[22].mxu1 }
 0x112   :  { %295 = vst [vmem:[#allocation2 + $0xb0] sm:$0xff] %v243_v47  ;;  %476 = vst.msk [vmem:[%s1757_s6 + $0x78] sm:$0xff] %vm460_vm3, %v1024_v48  ;;  %v245_v49 = vpop.f32.mrb[23].mxu0  ;;  %v451_v50 = vpop.f32.mrb[23].mxu1 }
 0x113   :  { %296 = vst.msk [vmem:[#allocation2 + $0xb8] sm:$0xff] %vm273_vm2, %v245_v49 }
 0x114   :  { %475 = vst.msk [vmem:[%s1757_s6 + $0x70] sm:$0xff] %vm460_vm3, %v451_v50 }
 0x115   :  { %1172 = shalt.err (!%p1169_p4)
}
 0x116   :  { %s1173_s20 = scalar_lea.hbm %s1756_s5, 4096 }
 0x117   :  { %p1174_p5 = scmp.ne.s32.totalorder %s1756_s5, %s1173_s20  ;;  %p1177_p6 = scmp.lt.u32.totalorder %s1173_s20, %s1756_s5 }
 0x119   :  { %p1179_p7 = pnand %p1177_p6, %p1174_p5 }
 0x11b   :  { %1182 = shalt.err (!%p1179_p7)
}
 0x11c   :  { %s1187_s6 = smov 256   ;;  %s1188_s25 = smov 16   ;;  %v1041_v51 = vpop.f32.mrb[24].mxu1  ;;  %v1079_v52 = vpop.f32.mrb[24].mxu0 }
 0x11d   :  { %832 = dma.vmem_to_hbm [thread:$0]  %s827_s2, 4096, %s1756_s5, [#allocation3], %s1187_s6, %s1187_s6, %s1188_s25   ;;  %v553_v53 = vpop.f32.mrb[25].mxu1  ;;  %v725_v54 = vpop.f32.mrb[25].mxu0 }
 0x11e   :  { %634 = vst.msk [vmem:[%s1758_s7 + $0x8] sm:$0xff] %vm632_vm4, %v1041_v51  ;;  %633 = vst.msk [vmem:[%s1758_s7] sm:$0xff] %vm632_vm4, %v553_v53  ;;  %v1044_v55 = vpop.f32.mrb[26].mxu1  ;;  %v1082_v56 = vpop.f32.mrb[26].mxu0 }
 0x11f   :  { %806 = vst.msk [vmem:[%s1759_s8 + $0x8] sm:$0xff] %vm804_vm5, %v1079_v52  ;;  %805 = vst.msk [vmem:[%s1759_s8] sm:$0xff] %vm804_vm5, %v725_v54  ;;  %v563_v57 = vpop.f32.mrb[27].mxu1  ;;  %v735_v58 = vpop.f32.mrb[27].mxu0 }
 0x120   :  { %636 = vst.msk [vmem:[%s1758_s7 + $0x18] sm:$0xff] %vm632_vm4, %v1044_v55  ;;  %635 = vst.msk [vmem:[%s1758_s7 + $0x10] sm:$0xff] %vm632_vm4, %v563_v57  ;;  %v1047_v59 = vpop.f32.mrb[28].mxu1  ;;  %v1085_v60 = vpop.f32.mrb[28].mxu0 }
 0x121   :  { %808 = vst.msk [vmem:[%s1759_s8 + $0x18] sm:$0xff] %vm804_vm5, %v1082_v56  ;;  %807 = vst.msk [vmem:[%s1759_s8 + $0x10] sm:$0xff] %vm804_vm5, %v735_v58  ;;  %v573_v61 = vpop.f32.mrb[29].mxu1  ;;  %v745_v62 = vpop.f32.mrb[29].mxu0 }
 0x122   :  { %638 = vst.msk [vmem:[%s1758_s7 + $0x28] sm:$0xff] %vm632_vm4, %v1047_v59  ;;  %637 = vst.msk [vmem:[%s1758_s7 + $0x20] sm:$0xff] %vm632_vm4, %v573_v61  ;;  %v1050_v63 = vpop.f32.mrb[30].mxu1  ;;  %v1088_v0 = vpop.f32.mrb[30].mxu0 }
 0x123   :  { %810 = vst.msk [vmem:[%s1759_s8 + $0x28] sm:$0xff] %vm804_vm5, %v1085_v60  ;;  %809 = vst.msk [vmem:[%s1759_s8 + $0x20] sm:$0xff] %vm804_vm5, %v745_v62  ;;  %v583_v1 = vpop.f32.mrb[31].mxu1  ;;  %v755_v2 = vpop.f32.mrb[31].mxu0 }
 0x124   :  { %640 = vst.msk [vmem:[%s1758_s7 + $0x38] sm:$0xff] %vm632_vm4, %v1050_v63  ;;  %639 = vst.msk [vmem:[%s1758_s7 + $0x30] sm:$0xff] %vm632_vm4, %v583_v1 }
 0x125   :  { %812 = vst.msk [vmem:[%s1759_s8 + $0x38] sm:$0xff] %vm804_vm5, %v1088_v0  ;;  %811 = vst.msk [vmem:[%s1759_s8 + $0x30] sm:$0xff] %vm804_vm5, %v755_v2  ;;  %v1053_v3 = vpop.f32.mrb[32].mxu1  ;;  %v1091_v4 = vpop.f32.mrb[32].mxu0 }
 0x126   :  { %642 = vst.msk [vmem:[%s1758_s7 + $0x48] sm:$0xff] %vm632_vm4, %v1053_v3  ;;  %v593_v5 = vpop.f32.mrb[33].mxu1  ;;  %v765_v6 = vpop.f32.mrb[33].mxu0 }
 0x127   :  { %814 = vst.msk [vmem:[%s1759_s8 + $0x48] sm:$0xff] %vm804_vm5, %v1091_v4  ;;  %813 = vst.msk [vmem:[%s1759_s8 + $0x40] sm:$0xff] %vm804_vm5, %v765_v6 }
 0x128   :  { %641 = vst.msk [vmem:[%s1758_s7 + $0x40] sm:$0xff] %vm632_vm4, %v593_v5 }
 0x129   :  { %v1056_v7 = vpop.f32.mrb[34].mxu1  ;;  %v1094_v8 = vpop.f32.mrb[34].mxu0 }
 0x12a   :  { %644 = vst.msk [vmem:[%s1758_s7 + $0x58] sm:$0xff] %vm632_vm4, %v1056_v7  ;;  %v603_v9 = vpop.f32.mrb[35].mxu1  ;;  %v775_v10 = vpop.f32.mrb[35].mxu0 }
 0x12b   :  { %816 = vst.msk [vmem:[%s1759_s8 + $0x58] sm:$0xff] %vm804_vm5, %v1094_v8  ;;  %815 = vst.msk [vmem:[%s1759_s8 + $0x50] sm:$0xff] %vm804_vm5, %v775_v10 }
 0x12c   :  { %643 = vst.msk [vmem:[%s1758_s7 + $0x50] sm:$0xff] %vm632_vm4, %v603_v9 }
 0x12d   :  { %v1059_v11 = vpop.f32.mrb[36].mxu1  ;;  %v1097_v12 = vpop.f32.mrb[36].mxu0 }
 0x12e   :  { %646 = vst.msk [vmem:[%s1758_s7 + $0x68] sm:$0xff] %vm632_vm4, %v1059_v11  ;;  %v613_v13 = vpop.f32.mrb[37].mxu1  ;;  %v785_v14 = vpop.f32.mrb[37].mxu0 }
 0x12f   :  { %818 = vst.msk [vmem:[%s1759_s8 + $0x68] sm:$0xff] %vm804_vm5, %v1097_v12  ;;  %817 = vst.msk [vmem:[%s1759_s8 + $0x60] sm:$0xff] %vm804_vm5, %v785_v14 }
 0x130   :  { %645 = vst.msk [vmem:[%s1758_s7 + $0x60] sm:$0xff] %vm632_vm4, %v613_v13 }
 0x131   :  { %v1062_v15 = vpop.f32.mrb[38].mxu1  ;;  %v1100_v16 = vpop.f32.mrb[38].mxu0 }
 0x132   :  { %648 = vst.msk [vmem:[%s1758_s7 + $0x78] sm:$0xff] %vm632_vm4, %v1062_v15  ;;  %v623_v17 = vpop.f32.mrb[39].mxu1  ;;  %v795_v18 = vpop.f32.mrb[39].mxu0 }
 0x133   :  { %820 = vst.msk [vmem:[%s1759_s8 + $0x78] sm:$0xff] %vm804_vm5, %v1100_v16  ;;  %819 = vst.msk [vmem:[%s1759_s8 + $0x70] sm:$0xff] %vm804_vm5, %v795_v18 }
 0x134   :  { %647 = vst.msk [vmem:[%s1758_s7 + $0x70] sm:$0xff] %vm632_vm4, %v623_v17 }
 0x135   :  { %1183 = dma.done.wait [#allocation3], 4096  }
 0x136   :  { %1184 = vsyncadd [#allocation3], 4294963200 }
 0x137   :  { %848 = vsyncpa [#allocation3], 1 }

</bundles_post_ra>
